<compile_context>
chip_gen: v7x
topology: tpu7x:2x2x1
jax: 0.10.0
libtpu: 0.0.40
codegen_flags: <defaults>
</compile_context>

<pallas_src>
import functools

import numpy as np
import jax
import jax.numpy as jnp
from jax import lax
from jax.experimental import pallas as pl
from jax.experimental.pallas import tpu as pltpu


def _round_up(x, m):
    return (x + m - 1) // m * m


def _sepconv_kernel(x_hbm, fw_ref, o_ref, xbuf, sem, acc_ref, *,
                    k, dil, wp, th, tfetch, n_tiles):
    """One grid step = output rows [t*th, (t+1)*th) of image b.

    x_hbm : (N, C_in, Hp*Wp)   zero-padded input, flat spatial, left in HBM.
    fw_ref: (k*k, C_out, C_in) fused weights fw[tap] = pw * dw[:, tap] (VMEM).
    o_ref : (1, C_out, th*Wp)  lane-dense output slab for this tile.
    xbuf  : (2, C_in, tfetch)  double-buffered input tile (+halo) in VMEM.
    sem   : (2,)               DMA semaphores.
    acc_ref: (C_out, th*Wp)    f32 accumulator.
    """
    b = pl.program_id(0)
    t = pl.program_id(1)
    out_flat = th * wp
    xj_len = (k - 1) * dil * wp + out_flat     # flat extent needed per j-shift

    def tile_copy(tile_idx, slot):
        start = tile_idx * (th * wp)           # multiple of wp (wp % 128 == 0)
        return pltpu.make_async_copy(
            x_hbm.at[b, :, pl.ds(start, tfetch)], xbuf.at[slot], sem.at[slot])

    slot = t % 2

    @pl.when(t == 0)                  # first tile of this image: fetch it now
    def _():
        tile_copy(t, slot).start()

    @pl.when(t + 1 < n_tiles)         # prefetch next tile -> hides DMA behind compute
    def _():
        tile_copy(t + 1, (t + 1) % 2).start()

    tile_copy(t, slot).wait()         # wait for the current tile

    first = True
    for j in range(k):                # hoisted lane shifts: one relayout per j
        xj = xbuf[slot, :, pl.ds(j * dil, xj_len)]           # (C_in, xj_len)
        for i in range(k):
            off = i * dil * wp        # static, lane aligned (wp % 128 == 0)
            rhs = xj[:, off:off + out_flat]                  # aligned static slice
            w_t = fw_ref[i * k + j]                          # (C_out, C_in)
            part = jnp.dot(w_t, rhs, preferred_element_type=jnp.float32)   # MXU
            if first:
                acc_ref[...] = part
                first = False
            else:
                acc_ref[...] += part

    o_ref[0, :, :] = acc_ref[...].astype(o_ref.dtype)        # one lane-dense slab store


def _pick_h_tile(h_out, wp, c_in, c_out, k, dil, itemsize, budget_bytes=20 << 20):
    """Largest output-row tile whose per-step working set fits ~budget_bytes of VMEM.

    The ~20 MiB default keeps the double-buffered footprint well under v7x's 64 MiB
    physical VMEM; v5e/v6e (128 MiB) could use a larger budget.
    """
    halo_rows = (k - 1) * dil + 1
    per_row = wp * (2 * c_in * itemsize        # input double buffer
                    + c_in * itemsize          # j-shifted operand temp
                    + 4 * c_out                # f32 accumulator
                    + 2 * c_out * itemsize)    # pipelined output block
    fixed = 3 * wp * halo_rows * c_in * itemsize
    th = max(1, (budget_bytes - fixed) // per_row)
    return int(min(h_out, th))


def separable_conv2d(x_nchw, dw_weight, pw_weight, *, kernel_size=3, stride=1,
                     padding=1, dilation=1, h_tile=None):
    """Matches SeparableConv2d.forward (depthwise conv + 1x1 pointwise, bias=False).

    x_nchw:    (N, C_in, H, W)
    dw_weight: (C_in, 1, k, k)      -- nn.Conv2d(groups=C_in) weight
    pw_weight: (C_out, C_in, 1, 1)  -- nn.Conv2d 1x1 weight
    """
    assert stride == 1, "TODO(synk): strided depthwise path not implemented"
    n, c_in, h, w = x_nchw.shape
    c_out = pw_weight.shape[0]
    k, dil = kernel_size, dilation
    h_out = h + 2 * padding - dil * (k - 1)
    w_out = w + 2 * padding - dil * (k - 1)
    assert h_out > 0 and w_out > 0
    itemsize = x_nchw.dtype.itemsize

    wp = _round_up(w + 2 * padding, 128)       # lane-aligned row pitch
    if h_tile is None:
        h_tile = _pick_h_tile(h_out, wp, c_in, c_out, k, dil, itemsize)
    th = int(min(h_tile, h_out))
    n_tiles = -(-h_out // th)                  # cdiv
    out_flat = th * wp
    tfetch = (th + (k - 1) * dil + 1) * wp     # tile + halo + 1 spare row (keeps the
                                               # j-shifted slice inside real data)
    hp_pad = n_tiles * th + (k - 1) * dil + 1  # padded rows so every fetch is in-bounds

    # Zero pad: conv padding + lane padding + bottom rows for the last tile's halo.
    # NCHW end to end — only this pad and the final de-pad slice run outside the kernel.
    x_p = jnp.pad(x_nchw, ((0, 0), (0, 0),
                           (padding, hp_pad - h - padding),
                           (padding, wp - w - padding)))
    x_flat = x_p.reshape(n, c_in, hp_pad * wp)

    # Fold depthwise into pointwise (tiny, host side): fw[tap, o, c] = pw[o,c]*dw[c,tap].
    # Products formed in f32, then cast to the activation dtype (native MXU operands).
    dw_taps = dw_weight[:, 0, :, :].reshape(c_in, k * k).astype(jnp.float32)
    pw_mat = pw_weight[:, :, 0, 0].astype(jnp.float32)
    fw = (dw_taps.T[:, None, :] * pw_mat[None, :, :]).astype(x_nchw.dtype)

    kernel = functools.partial(_sepconv_kernel, k=k, dil=dil, wp=wp, th=th,
                               tfetch=tfetch, n_tiles=n_tiles)

    # Explicit scoped-VMEM limit from the actual tile footprint (+50% headroom).
    need = (2 * c_in * tfetch * itemsize
            + c_in * ((k - 1) * dil * wp + out_flat) * itemsize
            + c_out * out_flat * 4
            + 2 * c_out * out_flat * itemsize
            + 2 * k * k * c_out * c_in * itemsize)
    vmem_limit = int(min(max(1.5 * need, 8 * 2**20), 96 * 2**20))

    cost = pl.CostEstimate(
        flops=2 * n * k * k * c_out * c_in * h_out * w_out,
        transcendentals=0,
        bytes_accessed=(x_flat.size * itemsize
                        + fw.size * fw.dtype.itemsize
                        + n * c_out * n_tiles * out_flat * itemsize))

    out = pl.pallas_call(
        kernel,
        out_shape=jax.ShapeDtypeStruct((n, c_out, n_tiles * out_flat), x_nchw.dtype),
        grid_spec=pltpu.PrefetchScalarGridSpec(
            num_scalar_prefetch=0,
            grid=(n, n_tiles),
            in_specs=[
                pl.BlockSpec(memory_space=pl.ANY),                        # manual halo DMA
                pl.BlockSpec((k * k, c_out, c_in), lambda b, t: (0, 0, 0)),
            ],
            out_specs=pl.BlockSpec((1, c_out, out_flat), lambda b, t: (b, 0, t)),
            scratch_shapes=[
                pltpu.VMEM((2, c_in, tfetch), x_nchw.dtype),
                pltpu.SemaphoreType.DMA((2,)),
                pltpu.VMEM((c_out, out_flat), jnp.float32),
            ]),
        compiler_params=pltpu.CompilerParams(
            dimension_semantics=("parallel", "arbitrary"),
            vmem_limit_bytes=vmem_limit),
        cost_estimate=cost,
    )(x_flat, fw)

    # Free row-major reshape, then strip lane / row padding.
    out = out.reshape(n, c_out, n_tiles * th, wp)[:, :, :h_out, :w_out]
    return out


def _reference(x, dw_weight, pw_weight, *, padding, dilation):
    c_in = x.shape[1]
    y = lax.conv_general_dilated(
        x, dw_weight, window_strides=(1, 1),
        padding=[(padding, padding), (padding, padding)],
        rhs_dilation=(dilation, dilation),
        dimension_numbers=("NCHW", "OIHW", "NCHW"),
        feature_group_count=c_in)
    y = lax.conv_general_dilated(
        y, pw_weight, window_strides=(1, 1), padding="VALID",
        dimension_numbers=("NCHW", "OIHW", "NCHW"))
    return y


if __name__ == "__main__":
    key = jax.random.PRNGKey(0)
    kx, kd, kp = jax.random.split(key, 3)

    N, C_IN, H, W, C_OUT, K = 2, 4, 16, 16, 8, 3
    x = jax.random.normal(kx, (N, C_IN, H, W), dtype=jnp.float32)
    dw_weight = jax.random.normal(kd, (C_IN, 1, K, K), dtype=jnp.float32) * 0.1
    pw_weight = jax.random.normal(kp, (C_OUT, C_IN, 1, 1), dtype=jnp.float32) * 0.1

    # Config 1: k=3, pad=1, dil=1 with h_tile=8 -> 2 spatial tiles per image,
    # exercising the halo DMA + cross-tile prefetch chain.
    out1 = jax.block_until_ready(
        separable_conv2d(x, dw_weight, pw_weight, kernel_size=K, stride=1,
                         padding=1, dilation=1, h_tile=8))
    ref1 = jax.block_until_ready(
        _reference(x, dw_weight, pw_weight, padding=1, dilation=1))
    assert out1.shape == ref1.shape == (N, C_OUT, H, W), (out1.shape, ref1.shape)
    np.testing.assert_allclose(np.asarray(out1), np.asarray(ref1), rtol=1e-4, atol=1e-5)

    # Config 2: dilated conv (k=3, pad=2, dil=2), auto tile size (single-tile path).
    out2 = jax.block_until_ready(
        separable_conv2d(x, dw_weight, pw_weight, kernel_size=K, stride=1,
                         padding=2, dilation=2))
    ref2 = jax.block_until_ready(
        _reference(x, dw_weight, pw_weight, padding=2, dilation=2))
    assert out2.shape == ref2.shape, (out2.shape, ref2.shape)
    np.testing.assert_allclose(np.asarray(out2), np.asarray(ref2), rtol=1e-4, atol=1e-5)

    print("KERNEL_OK")
</pallas_src>

<mosaic_0001>
module attributes {stable_mosaic.version = 11 : i64} {
  func.func @_sepconv_kernel(%arg0: i32, %arg1: i32, %arg2: memref<2x4x2432xf32, #tpu.memory_space<any>>, %arg3: memref<9x8x4xf32, #tpu.memory_space<vmem>>, %arg4: memref<1x8x1024xf32, #tpu.memory_space<vmem>>, %arg5: memref<2x4x1408xf32, #tpu.memory_space<vmem>>, %arg6: memref<2x!tpu.dma_semaphore, #tpu.memory_space<semaphore_mem>>, %arg7: memref<8x1024xf32, #tpu.memory_space<vmem>>) attributes {dimension_semantics = [#tpu.dimension_semantics<parallel>, #tpu.dimension_semantics<arbitrary>], iteration_bounds = array<i64: 2, 2>, scalar_prefetch = 0 : i64, scratch_operands = 3 : i64, tpu.core_type = #tpu.core_type<tc>, window_params = [{}, {pipeline_mode = #tpu.pipeline_mode<synchronous>, transform_indices = @transform_1, window_bounds = array<i64: 9, 8, 4>}, {transform_indices = @transform_2, window_bounds = array<i64: 1, 8, 1024>}]} {
    %c2_i32 = arith.constant 2 : i32
    %c0_i32 = arith.constant 0 : i32
    %0 = arith.cmpi eq, %c2_i32, %c0_i32 : i32
    %c1_i32 = arith.constant 1 : i32
    %1 = arith.select %0, %c1_i32, %c2_i32 : i32
    %2 = arith.remsi %arg1, %1 : i32
    %c0_i32_0 = arith.constant 0 : i32
    %3 = arith.cmpi ne, %2, %c0_i32_0 : i32
    %c0_i32_1 = arith.constant 0 : i32
    %4 = arith.cmpi slt, %2, %c0_i32_1 : i32
    %c0_i32_2 = arith.constant 0 : i32
    %5 = arith.cmpi slt, %1, %c0_i32_2 : i32
    %6 = arith.xori %4, %5 : i1
    %7 = arith.andi %6, %3 : i1
    %8 = arith.addi %2, %1 : i32
    %9 = arith.select %7, %8, %2 : i32
    %c0_i32_3 = arith.constant 0 : i32
    %10 = arith.cmpi eq, %arg1, %c0_i32_3 : i32
    %11 = arith.extui %10 : i1 to i32
    %c0_i32_4 = arith.constant 0 : i32
    %12 = arith.cmpi ne, %11, %c0_i32_4 : i32
    scf.if %12 {
      %c1024_i32_82 = arith.constant 1024 : i32
      %98 = arith.muli %arg1, %c1024_i32_82 : i32
      %c0_i32_83 = arith.constant 0 : i32
      %99 = tpu.memref_slice %arg2[%arg0, %c0_i32_83, %98] : memref<2x4x2432xf32, #tpu.memory_space<any>> -> memref<1x4x1408xf32, #tpu.memory_space<any>>
      %100 = tpu.memref_squeeze %99 : memref<1x4x1408xf32, #tpu.memory_space<any>> -> memref<4x1408xf32, #tpu.memory_space<any>>
      %c0_i32_84 = arith.constant 0 : i32
      %c0_i32_85 = arith.constant 0 : i32
      %101 = tpu.memref_slice %arg5[%9, %c0_i32_84, %c0_i32_85] : memref<2x4x1408xf32, #tpu.memory_space<vmem>> -> memref<1x4x1408xf32, #tpu.memory_space<vmem>>
      %102 = tpu.memref_squeeze %101 : memref<1x4x1408xf32, #tpu.memory_space<vmem>> -> memref<4x1408xf32, #tpu.memory_space<vmem>>
      %103 = tpu.memref_slice %arg6[%9] : memref<2x!tpu.dma_semaphore, #tpu.memory_space<semaphore_mem>> -> memref<1x!tpu.dma_semaphore, #tpu.memory_space<semaphore_mem>>
      %104 = tpu.memref_squeeze %103 : memref<1x!tpu.dma_semaphore, #tpu.memory_space<semaphore_mem>> -> memref<!tpu.dma_semaphore, #tpu.memory_space<semaphore_mem>>
      tpu.enqueue_dma source(%100 : memref<4x1408xf32, #tpu.memory_space<any>>) target(%102 : memref<4x1408xf32, #tpu.memory_space<vmem>>) target_semaphore(%104 : memref<!tpu.dma_semaphore, #tpu.memory_space<semaphore_mem>>)
    } else {
    }
    %c1_i32_5 = arith.constant 1 : i32
    %13 = arith.addi %arg1, %c1_i32_5 : i32
    %c2_i32_6 = arith.constant 2 : i32
    %14 = arith.cmpi slt, %13, %c2_i32_6 : i32
    %15 = arith.extui %14 : i1 to i32
    %c0_i32_7 = arith.constant 0 : i32
    %16 = arith.cmpi ne, %15, %c0_i32_7 : i32
    scf.if %16 {
      %c1_i32_82 = arith.constant 1 : i32
      %98 = arith.addi %arg1, %c1_i32_82 : i32
      %c1_i32_83 = arith.constant 1 : i32
      %99 = arith.addi %arg1, %c1_i32_83 : i32
      %c2_i32_84 = arith.constant 2 : i32
      %c0_i32_85 = arith.constant 0 : i32
      %100 = arith.cmpi eq, %c2_i32_84, %c0_i32_85 : i32
      %c1_i32_86 = arith.constant 1 : i32
      %101 = arith.select %100, %c1_i32_86, %c2_i32_84 : i32
      %102 = arith.remsi %99, %101 : i32
      %c0_i32_87 = arith.constant 0 : i32
      %103 = arith.cmpi ne, %102, %c0_i32_87 : i32
      %c0_i32_88 = arith.constant 0 : i32
      %104 = arith.cmpi slt, %102, %c0_i32_88 : i32
      %c0_i32_89 = arith.constant 0 : i32
      %105 = arith.cmpi slt, %101, %c0_i32_89 : i32
      %106 = arith.xori %104, %105 : i1
      %107 = arith.andi %106, %103 : i1
      %108 = arith.addi %102, %101 : i32
      %109 = arith.select %107, %108, %102 : i32
      %c1024_i32_90 = arith.constant 1024 : i32
      %110 = arith.muli %98, %c1024_i32_90 : i32
      %c0_i32_91 = arith.constant 0 : i32
      %111 = tpu.memref_slice %arg2[%arg0, %c0_i32_91, %110] : memref<2x4x2432xf32, #tpu.memory_space<any>> -> memref<1x4x1408xf32, #tpu.memory_space<any>>
      %112 = tpu.memref_squeeze %111 : memref<1x4x1408xf32, #tpu.memory_space<any>> -> memref<4x1408xf32, #tpu.memory_space<any>>
      %c0_i32_92 = arith.constant 0 : i32
      %c0_i32_93 = arith.constant 0 : i32
      %113 = tpu.memref_slice %arg5[%109, %c0_i32_92, %c0_i32_93] : memref<2x4x1408xf32, #tpu.memory_space<vmem>> -> memref<1x4x1408xf32, #tpu.memory_space<vmem>>
      %114 = tpu.memref_squeeze %113 : memref<1x4x1408xf32, #tpu.memory_space<vmem>> -> memref<4x1408xf32, #tpu.memory_space<vmem>>
      %115 = tpu.memref_slice %arg6[%109] : memref<2x!tpu.dma_semaphore, #tpu.memory_space<semaphore_mem>> -> memref<1x!tpu.dma_semaphore, #tpu.memory_space<semaphore_mem>>
      %116 = tpu.memref_squeeze %115 : memref<1x!tpu.dma_semaphore, #tpu.memory_space<semaphore_mem>> -> memref<!tpu.dma_semaphore, #tpu.memory_space<semaphore_mem>>
      tpu.enqueue_dma source(%112 : memref<4x1408xf32, #tpu.memory_space<any>>) target(%114 : memref<4x1408xf32, #tpu.memory_space<vmem>>) target_semaphore(%116 : memref<!tpu.dma_semaphore, #tpu.memory_space<semaphore_mem>>)
    } else {
    }
    %c1024_i32 = arith.constant 1024 : i32
    %17 = arith.muli %arg1, %c1024_i32 : i32
    %c0_i32_8 = arith.constant 0 : i32
    %18 = tpu.memref_slice %arg2[%arg0, %c0_i32_8, %17] : memref<2x4x2432xf32, #tpu.memory_space<any>> -> memref<1x4x1408xf32, #tpu.memory_space<any>>
    %19 = tpu.memref_squeeze %18 : memref<1x4x1408xf32, #tpu.memory_space<any>> -> memref<4x1408xf32, #tpu.memory_space<any>>
    %c0_i32_9 = arith.constant 0 : i32
    %c0_i32_10 = arith.constant 0 : i32
    %20 = tpu.memref_slice %arg5[%9, %c0_i32_9, %c0_i32_10] : memref<2x4x1408xf32, #tpu.memory_space<vmem>> -> memref<1x4x1408xf32, #tpu.memory_space<vmem>>
    %21 = tpu.memref_squeeze %20 : memref<1x4x1408xf32, #tpu.memory_space<vmem>> -> memref<4x1408xf32, #tpu.memory_space<vmem>>
    %22 = tpu.memref_slice %arg6[%9] : memref<2x!tpu.dma_semaphore, #tpu.memory_space<semaphore_mem>> -> memref<1x!tpu.dma_semaphore, #tpu.memory_space<semaphore_mem>>
    %23 = tpu.memref_squeeze %22 : memref<1x!tpu.dma_semaphore, #tpu.memory_space<semaphore_mem>> -> memref<!tpu.dma_semaphore, #tpu.memory_space<semaphore_mem>>
    tpu.wait_dma2 semaphore(%23 : memref<!tpu.dma_semaphore, #tpu.memory_space<semaphore_mem>>) src(%19 : memref<4x1408xf32, #tpu.memory_space<any>>) dst(%21 : memref<4x1408xf32, #tpu.memory_space<vmem>>)
    %24 = arith.index_cast %9 : i32 to index
    %c0 = arith.constant 0 : index
    %c0_11 = arith.constant 0 : index
    %25 = vector.load %arg5[%24, %c0, %c0_11] : memref<2x4x1408xf32, #tpu.memory_space<vmem>>, vector<1x4x1280xf32>
    %26 = vector.shape_cast %25 : vector<1x4x1280xf32> to vector<4x1280xf32>
    %27 = vector.extract_strided_slice %26 {offsets = [0, 0], sizes = [4, 1024], strides = [1, 1]} : vector<4x1280xf32> to vector<4x1024xf32>
    %c0_12 = arith.constant 0 : index
    %c0_13 = arith.constant 0 : index
    %c0_14 = arith.constant 0 : index
    %28 = vector.load %arg3[%c0_12, %c0_13, %c0_14] : memref<9x8x4xf32, #tpu.memory_space<vmem>>, vector<1x8x4xf32>
    %29 = vector.shape_cast %28 : vector<1x8x4xf32> to vector<8x4xf32>
    %cst = arith.constant dense<0.000000e+00> : vector<8x1024xf32>
    %30 = tpu.matmul %29, %27, %cst {dimension_numbers = #tpu.dot_dimension_numbers<[1], [0], [0], [1], [0, 0, 1, 1], [], []>} : vector<8x4xf32>, vector<4x1024xf32>, vector<8x1024xf32> -> vector<8x1024xf32>
    %c0_15 = arith.constant 0 : index
    %c0_16 = arith.constant 0 : index
    %31 = vector.load %arg7[%c0_15, %c0_16] : memref<8x1024xf32, #tpu.memory_space<vmem>>, vector<8x1024xf32>
    tpu.vector_store %arg7[%c0_15, %c0_16], %30 {strides = array<i32>} : memref<8x1024xf32, #tpu.memory_space<vmem>>, vector<8x1024xf32>,
    %32 = vector.extract_strided_slice %26 {offsets = [0, 128], sizes = [4, 1024], strides = [1, 1]} : vector<4x1280xf32> to vector<4x1024xf32>
    %c3 = arith.constant 3 : index
    %c0_17 = arith.constant 0 : index
    %c0_18 = arith.constant 0 : index
    %33 = vector.load %arg3[%c3, %c0_17, %c0_18] : memref<9x8x4xf32, #tpu.memory_space<vmem>>, vector<1x8x4xf32>
    %34 = vector.shape_cast %33 : vector<1x8x4xf32> to vector<8x4xf32>
    %cst_19 = arith.constant dense<0.000000e+00> : vector<8x1024xf32>
    %35 = tpu.matmul %34, %32, %cst_19 {dimension_numbers = #tpu.dot_dimension_numbers<[1], [0], [0], [1], [0, 0, 1, 1], [], []>} : vector<8x4xf32>, vector<4x1024xf32>, vector<8x1024xf32> -> vector<8x1024xf32>
    %c0_20 = arith.constant 0 : index
    %c0_21 = arith.constant 0 : index
    %36 = vector.load %arg7[%c0_20, %c0_21] : memref<8x1024xf32, #tpu.memory_space<vmem>>, vector<8x1024xf32>
    %37 = arith.addf %36, %35 : vector<8x1024xf32>
    %c0_22 = arith.constant 0 : index
    %c0_23 = arith.constant 0 : index
    %38 = vector.load %arg7[%c0_22, %c0_23] : memref<8x1024xf32, #tpu.memory_space<vmem>>, vector<8x1024xf32>
    tpu.vector_store %arg7[%c0_22, %c0_23], %37 {strides = array<i32>} : memref<8x1024xf32, #tpu.memory_space<vmem>>, vector<8x1024xf32>,
    %39 = vector.extract_strided_slice %26 {offsets = [0, 256], sizes = [4, 1024], strides = [1, 1]} : vector<4x1280xf32> to vector<4x1024xf32>
    %c6 = arith.constant 6 : index
    %c0_24 = arith.constant 0 : index
    %c0_25 = arith.constant 0 : index
    %40 = vector.load %arg3[%c6, %c0_24, %c0_25] : memref<9x8x4xf32, #tpu.memory_space<vmem>>, vector<1x8x4xf32>
    %41 = vector.shape_cast %40 : vector<1x8x4xf32> to vector<8x4xf32>
    %cst_26 = arith.constant dense<0.000000e+00> : vector<8x1024xf32>
    %42 = tpu.matmul %41, %39, %cst_26 {dimension_numbers = #tpu.dot_dimension_numbers<[1], [0], [0], [1], [0, 0, 1, 1], [], []>} : vector<8x4xf32>, vector<4x1024xf32>, vector<8x1024xf32> -> vector<8x1024xf32>
    %c0_27 = arith.constant 0 : index
    %c0_28 = arith.constant 0 : index
    %43 = vector.load %arg7[%c0_27, %c0_28] : memref<8x1024xf32, #tpu.memory_space<vmem>>, vector<8x1024xf32>
    %44 = arith.addf %43, %42 : vector<8x1024xf32>
    %c0_29 = arith.constant 0 : index
    %c0_30 = arith.constant 0 : index
    %45 = vector.load %arg7[%c0_29, %c0_30] : memref<8x1024xf32, #tpu.memory_space<vmem>>, vector<8x1024xf32>
    tpu.vector_store %arg7[%c0_29, %c0_30], %44 {strides = array<i32>} : memref<8x1024xf32, #tpu.memory_space<vmem>>, vector<8x1024xf32>,
    %46 = arith.index_cast %9 : i32 to index
    %c0_31 = arith.constant 0 : index
    %c1 = arith.constant 1 : index
    %47 = vector.load %arg5[%46, %c0_31, %c1] : memref<2x4x1408xf32, #tpu.memory_space<vmem>>, vector<1x4x1280xf32>
    %48 = vector.shape_cast %47 : vector<1x4x1280xf32> to vector<4x1280xf32>
    %49 = vector.extract_strided_slice %48 {offsets = [0, 0], sizes = [4, 1024], strides = [1, 1]} : vector<4x1280xf32> to vector<4x1024xf32>
    %c1_32 = arith.constant 1 : index
    %c0_33 = arith.constant 0 : index
    %c0_34 = arith.constant 0 : index
    %50 = vector.load %arg3[%c1_32, %c0_33, %c0_34] : memref<9x8x4xf32, #tpu.memory_space<vmem>>, vector<1x8x4xf32>
    %51 = vector.shape_cast %50 : vector<1x8x4xf32> to vector<8x4xf32>
    %cst_35 = arith.constant dense<0.000000e+00> : vector<8x1024xf32>
    %52 = tpu.matmul %51, %49, %cst_35 {dimension_numbers = #tpu.dot_dimension_numbers<[1], [0], [0], [1], [0, 0, 1, 1], [], []>} : vector<8x4xf32>, vector<4x1024xf32>, vector<8x1024xf32> -> vector<8x1024xf32>
    %c0_36 = arith.constant 0 : index
    %c0_37 = arith.constant 0 : index
    %53 = vector.load %arg7[%c0_36, %c0_37] : memref<8x1024xf32, #tpu.memory_space<vmem>>, vector<8x1024xf32>
    %54 = arith.addf %53, %52 : vector<8x1024xf32>
    %c0_38 = arith.constant 0 : index
    %c0_39 = arith.constant 0 : index
    %55 = vector.load %arg7[%c0_38, %c0_39] : memref<8x1024xf32, #tpu.memory_space<vmem>>, vector<8x1024xf32>
    tpu.vector_store %arg7[%c0_38, %c0_39], %54 {strides = array<i32>} : memref<8x1024xf32, #tpu.memory_space<vmem>>, vector<8x1024xf32>,
    %56 = vector.extract_strided_slice %48 {offsets = [0, 128], sizes = [4, 1024], strides = [1, 1]} : vector<4x1280xf32> to vector<4x1024xf32>
    %c4 = arith.constant 4 : index
    %c0_40 = arith.constant 0 : index
    %c0_41 = arith.constant 0 : index
    %57 = vector.load %arg3[%c4, %c0_40, %c0_41] : memref<9x8x4xf32, #tpu.memory_space<vmem>>, vector<1x8x4xf32>
    %58 = vector.shape_cast %57 : vector<1x8x4xf32> to vector<8x4xf32>
    %cst_42 = arith.constant dense<0.000000e+00> : vector<8x1024xf32>
    %59 = tpu.matmul %58, %56, %cst_42 {dimension_numbers = #tpu.dot_dimension_numbers<[1], [0], [0], [1], [0, 0, 1, 1], [], []>} : vector<8x4xf32>, vector<4x1024xf32>, vector<8x1024xf32> -> vector<8x1024xf32>
    %c0_43 = arith.constant 0 : index
    %c0_44 = arith.constant 0 : index
    %60 = vector.load %arg7[%c0_43, %c0_44] : memref<8x1024xf32, #tpu.memory_space<vmem>>, vector<8x1024xf32>
    %61 = arith.addf %60, %59 : vector<8x1024xf32>
    %c0_45 = arith.constant 0 : index
    %c0_46 = arith.constant 0 : index
    %62 = vector.load %arg7[%c0_45, %c0_46] : memref<8x1024xf32, #tpu.memory_space<vmem>>, vector<8x1024xf32>
    tpu.vector_store %arg7[%c0_45, %c0_46], %61 {strides = array<i32>} : memref<8x1024xf32, #tpu.memory_space<vmem>>, vector<8x1024xf32>,
    %63 = vector.extract_strided_slice %48 {offsets = [0, 256], sizes = [4, 1024], strides = [1, 1]} : vector<4x1280xf32> to vector<4x1024xf32>
    %c7 = arith.constant 7 : index
    %c0_47 = arith.constant 0 : index
    %c0_48 = arith.constant 0 : index
    %64 = vector.load %arg3[%c7, %c0_47, %c0_48] : memref<9x8x4xf32, #tpu.memory_space<vmem>>, vector<1x8x4xf32>
    %65 = vector.shape_cast %64 : vector<1x8x4xf32> to vector<8x4xf32>
    %cst_49 = arith.constant dense<0.000000e+00> : vector<8x1024xf32>
    %66 = tpu.matmul %65, %63, %cst_49 {dimension_numbers = #tpu.dot_dimension_numbers<[1], [0], [0], [1], [0, 0, 1, 1], [], []>} : vector<8x4xf32>, vector<4x1024xf32>, vector<8x1024xf32> -> vector<8x1024xf32>
    %c0_50 = arith.constant 0 : index
    %c0_51 = arith.constant 0 : index
    %67 = vector.load %arg7[%c0_50, %c0_51] : memref<8x1024xf32, #tpu.memory_space<vmem>>, vector<8x1024xf32>
    %68 = arith.addf %67, %66 : vector<8x1024xf32>
    %c0_52 = arith.constant 0 : index
    %c0_53 = arith.constant 0 : index
    %69 = vector.load %arg7[%c0_52, %c0_53] : memref<8x1024xf32, #tpu.memory_space<vmem>>, vector<8x1024xf32>
    tpu.vector_store %arg7[%c0_52, %c0_53], %68 {strides = array<i32>} : memref<8x1024xf32, #tpu.memory_space<vmem>>, vector<8x1024xf32>,
    %70 = arith.index_cast %9 : i32 to index
    %c0_54 = arith.constant 0 : index
    %c2 = arith.constant 2 : index
    %71 = vector.load %arg5[%70, %c0_54, %c2] : memref<2x4x1408xf32, #tpu.memory_space<vmem>>, vector<1x4x1280xf32>
    %72 = vector.shape_cast %71 : vector<1x4x1280xf32> to vector<4x1280xf32>
    %73 = vector.extract_strided_slice %72 {offsets = [0, 0], sizes = [4, 1024], strides = [1, 1]} : vector<4x1280xf32> to vector<4x1024xf32>
    %c2_55 = arith.constant 2 : index
    %c0_56 = arith.constant 0 : index
    %c0_57 = arith.constant 0 : index
    %74 = vector.load %arg3[%c2_55, %c0_56, %c0_57] : memref<9x8x4xf32, #tpu.memory_space<vmem>>, vector<1x8x4xf32>
    %75 = vector.shape_cast %74 : vector<1x8x4xf32> to vector<8x4xf32>
    %cst_58 = arith.constant dense<0.000000e+00> : vector<8x1024xf32>
    %76 = tpu.matmul %75, %73, %cst_58 {dimension_numbers = #tpu.dot_dimension_numbers<[1], [0], [0], [1], [0, 0, 1, 1], [], []>} : vector<8x4xf32>, vector<4x1024xf32>, vector<8x1024xf32> -> vector<8x1024xf32>
    %c0_59 = arith.constant 0 : index
    %c0_60 = arith.constant 0 : index
    %77 = vector.load %arg7[%c0_59, %c0_60] : memref<8x1024xf32, #tpu.memory_space<vmem>>, vector<8x1024xf32>
    %78 = arith.addf %77, %76 : vector<8x1024xf32>
    %c0_61 = arith.constant 0 : index
    %c0_62 = arith.constant 0 : index
    %79 = vector.load %arg7[%c0_61, %c0_62] : memref<8x1024xf32, #tpu.memory_space<vmem>>, vector<8x1024xf32>
    tpu.vector_store %arg7[%c0_61, %c0_62], %78 {strides = array<i32>} : memref<8x1024xf32, #tpu.memory_space<vmem>>, vector<8x1024xf32>,
    %80 = vector.extract_strided_slice %72 {offsets = [0, 128], sizes = [4, 1024], strides = [1, 1]} : vector<4x1280xf32> to vector<4x1024xf32>
    %c5 = arith.constant 5 : index
    %c0_63 = arith.constant 0 : index
    %c0_64 = arith.constant 0 : index
    %81 = vector.load %arg3[%c5, %c0_63, %c0_64] : memref<9x8x4xf32, #tpu.memory_space<vmem>>, vector<1x8x4xf32>
    %82 = vector.shape_cast %81 : vector<1x8x4xf32> to vector<8x4xf32>
    %cst_65 = arith.constant dense<0.000000e+00> : vector<8x1024xf32>
    %83 = tpu.matmul %82, %80, %cst_65 {dimension_numbers = #tpu.dot_dimension_numbers<[1], [0], [0], [1], [0, 0, 1, 1], [], []>} : vector<8x4xf32>, vector<4x1024xf32>, vector<8x1024xf32> -> vector<8x1024xf32>
    %c0_66 = arith.constant 0 : index
    %c0_67 = arith.constant 0 : index
    %84 = vector.load %arg7[%c0_66, %c0_67] : memref<8x1024xf32, #tpu.memory_space<vmem>>, vector<8x1024xf32>
    %85 = arith.addf %84, %83 : vector<8x1024xf32>
    %c0_68 = arith.constant 0 : index
    %c0_69 = arith.constant 0 : index
    %86 = vector.load %arg7[%c0_68, %c0_69] : memref<8x1024xf32, #tpu.memory_space<vmem>>, vector<8x1024xf32>
    tpu.vector_store %arg7[%c0_68, %c0_69], %85 {strides = array<i32>} : memref<8x1024xf32, #tpu.memory_space<vmem>>, vector<8x1024xf32>,
    %87 = vector.extract_strided_slice %72 {offsets = [0, 256], sizes = [4, 1024], strides = [1, 1]} : vector<4x1280xf32> to vector<4x1024xf32>
    %c8 = arith.constant 8 : index
    %c0_70 = arith.constant 0 : index
    %c0_71 = arith.constant 0 : index
    %88 = vector.load %arg3[%c8, %c0_70, %c0_71] : memref<9x8x4xf32, #tpu.memory_space<vmem>>, vector<1x8x4xf32>
    %89 = vector.shape_cast %88 : vector<1x8x4xf32> to vector<8x4xf32>
    %cst_72 = arith.constant dense<0.000000e+00> : vector<8x1024xf32>
    %90 = tpu.matmul %89, %87, %cst_72 {dimension_numbers = #tpu.dot_dimension_numbers<[1], [0], [0], [1], [0, 0, 1, 1], [], []>} : vector<8x4xf32>, vector<4x1024xf32>, vector<8x1024xf32> -> vector<8x1024xf32>
    %c0_73 = arith.constant 0 : index
    %c0_74 = arith.constant 0 : index
    %91 = vector.load %arg7[%c0_73, %c0_74] : memref<8x1024xf32, #tpu.memory_space<vmem>>, vector<8x1024xf32>
    %92 = arith.addf %91, %90 : vector<8x1024xf32>
    %c0_75 = arith.constant 0 : index
    %c0_76 = arith.constant 0 : index
    %93 = vector.load %arg7[%c0_75, %c0_76] : memref<8x1024xf32, #tpu.memory_space<vmem>>, vector<8x1024xf32>
    tpu.vector_store %arg7[%c0_75, %c0_76], %92 {strides = array<i32>} : memref<8x1024xf32, #tpu.memory_space<vmem>>, vector<8x1024xf32>,
    %c0_77 = arith.constant 0 : index
    %c0_78 = arith.constant 0 : index
    %94 = vector.load %arg7[%c0_77, %c0_78] : memref<8x1024xf32, #tpu.memory_space<vmem>>, vector<8x1024xf32>
    %c0_79 = arith.constant 0 : index
    %c0_80 = arith.constant 0 : index
    %c0_81 = arith.constant 0 : index
    %95 = vector.load %arg4[%c0_79, %c0_80, %c0_81] : memref<1x8x1024xf32, #tpu.memory_space<vmem>>, vector<1x8x1024xf32>
    %96 = vector.shape_cast %95 : vector<1x8x1024xf32> to vector<8x1024xf32>
    %97 = vector.shape_cast %94 : vector<8x1024xf32> to vector<1x8x1024xf32>
    tpu.vector_store %arg4[%c0_79, %c0_80, %c0_81], %97 {strides = array<i32>} : memref<1x8x1024xf32, #tpu.memory_space<vmem>>, vector<1x8x1024xf32>,
    return
  }
  func.func @transform_1(%arg0: i32, %arg1: i32) -> (i32, i32, i32) {
    %c0_i32 = arith.constant 0 : i32
    %c0_i32_0 = arith.constant 0 : i32
    %c0_i32_1 = arith.constant 0 : i32
    %c0_i32_2 = arith.constant 0 : i32
    return %c0_i32, %c0_i32_0, %c0_i32_1 : i32, i32, i32
  }
  func.func @transform_2(%arg0: i32, %arg1: i32) -> (i32, i32, i32) {
    %c0_i32 = arith.constant 0 : i32
    %c0_i32_0 = arith.constant 0 : i32
    return %arg0, %c0_i32, %arg1 : i32, i32, i32
  }
}

</mosaic_0001>

<bundles_post_ra>
// kernel: tpu_custom_call.1
= control target key start
LH: loop header
LB: loop body
LE: loop exit
PB: predicated region body
PF: predicated region fallthrough
CT: control target
= control target key end

     0   :  { %7 = vsyncpa [#allocation6], 0  ;;  %s4276_s0 = inlined_call_operand.hbm [shape: f32[2,4,2432], index: 0, kind: input, shape index: {}]   ;;  %s4277_s1 = inlined_call_operand.vmem [shape: f32[9,8,4], index: 1, kind: input, shape index: {}]   ;;  %s4278_s2 = inlined_call_operand.hbm [shape: f32[2,8,2048], index: 2, kind: output, shape index: {}]  }
   0x1   :  { %9 = vsyncpa [#allocation6 + $0x1], 0  ;;  %s3769_s9 = smov 0   ;;  %s3771_s10 = smov 0  }
   0x2   :  { %s3773_s11 = smov 0   ;;  %s3775_s12 = smov 0  }
   0x3   :  { %s3777_s13 = smov 0   ;;  %s3779_s14 = smov 0  }
   0x4   :  { %s3781_s15 = smov 0   ;;  %s3783_s16 = smov 0  }
   0x5 LB: > { %4288 = sst [smem:[#allocation15_spill]] %s3739_s14  ;;  %s3297_s17 = sadd.s32 4294967295, %s3747_s16   ;;  %s3747_s16 = sphi %s3783_s16, %s15_s16   ;;  %s3743_s15 = sphi %s3781_s15, %s4305_s15   ;;  %s3739_s14 = sphi %s3779_s14, %s4304_s14   ;;  %s3735_s13 = sphi %s3777_s13, %s4303_s13   ;;  %s3731_s12 = sphi %s3775_s12, %s4302_s12   ;;  %s3727_s11 = sphi %s3773_s11, %s4308_s11   ;;  %s3723_s10 = sphi %s3771_s10, %s4307_s10   ;;  %s3719_s9 = sphi %s3769_s9, %s4306_s9  }
   0x6   : > { %4289 = sst [smem:[#allocation16_spill]] %s3743_s15  ;;  %s3298_s18 = sadd.s32 4294967294, %s3747_s16  }
   0x7   : > { %s24_s19 = sadd.s32 1, %s3739_s14  ;;  %s27_s20 = sadd.s32 1, %s3743_s15 }
   0x8   : > { %p25_p0 = scmp.ge.s32.totalorder %s24_s19, 2  ;;  %p67_p1 = scmp.ne.s32.totalorder %s3727_s11, %s3723_s10 }
   0x9   : > { %p68_p2 = scmp.eq.s32.totalorder %s3297_s17, 3  ;;  %p73_p5 = scmp.ne.s32.totalorder %s3723_s10, %s3719_s9 }
   0xa   : > { %s4310_s19 = smov (%p25_p0, %s24_s19), 0  ;;  %s4312_s20 = smov (!%p25_p0, %s27_s20), %s3743_s15 }
   0xb   : > { %4290 = sst [smem:[#allocation17_spill]] %s4310_s19  ;;  %s53_s21 = ssub.s32 %s3739_s14, %s4310_s19 }
   0xc   : > { %p3820_p3 = por %p68_p2, %p67_p1  ;;  %p29_p4 = scmp.ge.s32.totalorder %s4312_s20, 2 }
   0xd   : > { %p74_p6 = scmp.eq.s32.totalorder %s3298_s18, 3  ;;  %p3300_p7 = scmp.ge.s32.totalorder %s3747_s16, 1 }
   0xe   : > { %s4291_s22 = scalar_select %p3820_p3, 1, 0 }
   0xf   : > { %s4314_s20 = smov (%p29_p4, %s4312_s20), 0  ;;  %p3829_p8 = por %p74_p6, %p73_p5 }
  0x10   : > { %4292 = sst [smem:[#allocation18_spill]] %s4314_s20  ;;  %p95_p9 = scmp.lt.s32.totalorder %s3747_s16, 5 }
  0x11   : > { %s4293_s23 = scalar_select %p3829_p8, 1, 0 }
  0x12   : > { %s52_s24 = ssub.s32 %s3743_s15, %s4314_s20  ;;  %s57_s25 = sadd.s32 1, %s3727_s11 }
  0x13   : > { %s54_s26 = sor.u32 %s53_s21, %s52_s24  ;;  %p96_p10 = pnand %p3300_p7, %p95_p9 }
  0x14   : > { %p55_p11 = scmp.eq.s32.totalorder %s54_s26, 0  ;;  %s4279_s28 = sand.u32 (!%p96_p10), 1, %s3723_s10  }
  0x15   : > { %99 = sbr.rel (%p96_p10) target bundleno = 492 (0x1ec), region = 24  ;;  %p111_p12 = scmp.lt.s32.totalorder (!%p96_p10), %s3731_s12, 0 }
  0x16   : > { %s3838_s27 = scalar_select %p55_p11, %s3727_s11, %s57_s25  }
  0x17   : > { %s3844_s29 = sshll.u32 (!%p96_p10), %s4279_s28, 6  ;;  %s112_s30 = ssub.s32 (!%p96_p10), 0, %s3731_s12 }
  0x18   : > { %4294 = sst [smem:[#allocation19_spill]] %s3838_s27  ;;  %s3302_s3 = smin.u32 (!%p96_p10), %s3731_s12, %s112_s30 }
  0x19   : > { %s114_s4 = sand.u32 (!%p96_p10), 1, %s3302_s3   ;;  %s3306_s6 = sshll.u32 (!%p96_p10), %s3731_s12, 10 }
  0x1a   : > { %s115_s5 = ssub.s32 (!%p96_p10), 0, %s114_s4  ;;  %s4280_s7 = smul.u32 (!%p96_p10), 19, %s3735_s13 }
  0x1b   : > { %p3520_p0 = scmp.eq.s32.totalorder (!%p96_p10), %s3731_s12, 0  ;;  %s128_s17 = sshra.s32 (!%p96_p10), %s3306_s6, 7 }
  0x1c   : > { %s4316_s5 = smov (!%p111_p12, %s115_s5), %s114_s4  ;;  %s131_s18 = sadd.s32 %s4280_s7, %s128_s17 }
  0x1d   : > { %p3304_p13 = scmp.lt.s32.totalorder %s4316_s5, 0  ;;  %s121_s8 = sadd.s32 2, %s4316_s5 }
  0x1e   : > { %s3854_s21 = sadd.s32 1, %s3731_s12  ;;  %s3307_s24 = sshll.u32 %s131_s18, 6 }
  0x1f   : > { %s4318_s8 = smov (!%p3304_p13, %s121_s8), %s4316_s5  ;;  %s3859_s3 = scalar_lea.hbm %s4276_s0, %s3307_s24 }
  0x20   : > { %s3441_s25 = smul.u32 44, %s4318_s8  ;;  %s3864_s28 = sadd.s32 1024, %s3306_s6 }
  0x21   : > { %p154_p1 = scmp.lt.s32.totalorder %s3854_s21, 0  ;;  %s3869_s17 = scalar_lea.sflag [#allocation3], %s4318_s8 }
  0x22   : > { %s3861_s4 = scalar_lea.vmem [#allocation2], %s3441_s25  ;;  %s3595_s18 = scalar_lea.hbm %s3859_s3, 704 }
  0x23   : > { %s145_s5 = sshll.u32 %s3861_s4, 4  ;;  %p3596_p2 = scmp.ne.s32.totalorder %s3859_s3, %s3595_s18  ;;  %s3866_s5 = int_to_ptr.vmem [resolvable:$true] %s145_s5 }
  0x24   : > { %s4283_s30 = scalar_lea.hbm %s4276_s0, 2432  ;;  %p3600_p6 = scmp.lt.u32.totalorder %s3859_s3, %s4276_s0 }
  0x25   : > { %p3597_p4 = pnand %p3596_p2, %p3520_p0  ;;  %p3601_p7 = scmp.lt.u32.totalorder %s4283_s30, %s3595_s18 }
  0x26   : > { %p3603_p10 = scmp.lt.u32.totalorder %s3595_s18, %s3859_s3 }
  0x27   : > { %p3598_p5 = pneg %p3597_p4  ;;  %p3602_p9 = por %p3601_p7, %p3600_p6 }
  0x29   : > { %p3604_p11 = por %p3603_p10, %p3602_p9 }
  0x2b   : > { %p3605_p12 = pnand %p3604_p11, %p3598_p5 }
  0x2d   : > { %3608 = shalt.err (!%p3605_p12)  }
  0x2e   : > { %s3609_s8 = scalar_lea.vmem %s3866_s5, 704  ;;  %s3749_s7 = smov [#allocation2]  }
  0x2f   : > { %p3610_p13 = scmp.ne.s32.totalorder %s3866_s5, %s3609_s8  ;;  %s3613_s24 = sshll.u32 %s3749_s7, 4  ;;  %s3891_s24 = int_to_ptr.vmem [resolvable:$false] %s3613_s24 }
  0x30   : > { %s4282_s20 = scalar_lea.vmem %s3891_s24, 1408  ;;  %p3616_p6 = scmp.lt.s32.totalorder %s3866_s5, %s3891_s24 }
  0x31   : > { %p3611_p2 = pnand %p3610_p13, %p3520_p0  ;;  %p3617_p5 = scmp.lt.s32.totalorder %s4282_s20, %s3609_s8 }
  0x33   : > { %p3612_p4 = pneg %p3611_p2  ;;  %p3618_p7 = por %p3617_p5, %p3616_p6 }
  0x35   : > { %p3619_p9 = pnand %p3618_p7, %p3612_p4 }
  0x37   : > { %3622 = shalt.err (!%p3619_p9)  }
  0x38   : > { %3511 = dma.hbm_to_vmem [thread:$0]  (%p3520_p0), %s3859_s3, 704, %s3866_s5, %s3869_s17 }
  0x39   : > { %s155_s18 = ssub.s32 0, %s3854_s21  ;;  %s167_s26 = sshra.s32 %s3864_s28, 7 }
  0x3a   : > { %s3310_s25 = smin.u32 %s155_s18, %s3854_s21  ;;  %s4295_s7 = smul.u32 19, %s3735_s13 }
  0x3b   : > { %s157_s6 = sand.u32 1, %s3310_s25   ;;  %p3521_p11 = scmp.lt.s32.totalorder %s3854_s21, 2 }
  0x3c   : > { %s158_s8 = ssub.s32 0, %s157_s6  ;;  %s170_s20 = sadd.s32 %s167_s26, %s4295_s7 }
  0x3d   : > { %s4320_s8 = smov (!%p154_p1, %s158_s8), %s157_s6  ;;  %s3314_s19 = sshll.u32 %s170_s20, 6 }
  0x3e   : > { %p3312_p10 = scmp.lt.s32.totalorder %s4320_s8, 0  ;;  %s164_s30 = sadd.s32 2, %s4320_s8 }
  0x3f   : > { %s172_s28 = scalar_lea.hbm %s4276_s0, %s3314_s19  ;;  %s4296_s27 = scalar_lea.hbm %s4276_s0, 2432 }
  0x40   : > { %s4322_s30 = smov (!%p3312_p10, %s164_s30), %s4320_s8  ;;  %s3623_s26 = scalar_lea.hbm %s172_s28, 704 }
  0x41   : > { %s3444_s15 = smul.u32 44, %s4322_s30  ;;  %s176_s14 = scalar_lea.sflag [#allocation3], %s4322_s30 }
  0x42   : > { %p3624_p0 = scmp.ne.s32.totalorder %s172_s28, %s3623_s26  ;;  %p3628_p13 = scmp.lt.u32.totalorder %s172_s28, %s4276_s0 }
  0x43   : > { %s175_s18 = scalar_lea.vmem [#allocation2], %s3444_s15  ;;  %p3629_p2 = scmp.lt.u32.totalorder %s4296_s27, %s3623_s26 }
  0x44   : > { %s184_s25 = sshll.u32 %s175_s18, 4  ;;  %p3625_p1 = pnand %p3624_p0, %p3521_p11  ;;  %s185_s25 = int_to_ptr.vmem [resolvable:$true] %s184_s25 }
  0x45   : > { %p3630_p4 = por %p3629_p2, %p3628_p13  ;;  %p3631_p6 = scmp.lt.u32.totalorder %s3623_s26, %s172_s28 }
  0x46   : > { %p3626_p12 = pneg %p3625_p1 }
  0x47   : > { %p3632_p5 = por %p3631_p6, %p3630_p4 }
  0x49   : > { %p3633_p7 = pnand %p3632_p5, %p3626_p12 }
  0x4b   : > { %3636 = shalt.err (!%p3633_p7)  }
  0x4c   : > { %s3637_s15 = scalar_lea.vmem %s185_s25, 704  ;;  %p3644_p1 = scmp.lt.s32.totalorder %s185_s25, %s3891_s24 }
  0x4d   : > { %p3638_p9 = scmp.ne.s32.totalorder %s185_s25, %s3637_s15  ;;  %s4297_s19 = scalar_lea.vmem %s3891_s24, 1408 }
  0x4e   : > { %p3645_p8 = scmp.lt.s32.totalorder %s4297_s19, %s3637_s15 }
  0x4f   : > { %p3639_p10 = pnand %p3638_p9, %p3521_p11 }
  0x50   : > { %p3646_p3 = por %p3645_p8, %p3644_p1 }
  0x51   : > { %p3640_p0 = pneg %p3639_p10 }
  0x53   : > { %p3647_p2 = pnand %p3646_p3, %p3640_p0 }
  0x55   : > { %3650 = shalt.err (!%p3647_p2)  }
  0x56   : > { %3513 = dma.hbm_to_vmem [thread:$0]  (%p3521_p11), %s172_s28, 704, %s185_s25, %s176_s14 }
  0x57   : > { %s3935_s27 = scalar_lea.vmem [#allocation5], %s3844_s29 }
  0x58   : > { %3711 = dma.done.wait %s3869_s17, 704 }
  0x59   : > { %3712 = vsyncadd %s3869_s17, 4294966592  ;;  %v3750_v0 = vmov 0.0   ;;  %v3942_v1 = vld [vmem:[%s3861_s4 + $0x10] sm:$0xff]  ;;  %v3945_v2 = vld [vmem:[%s3861_s4 + $0x8] sm:$0xff]  ;;  %vm214_vm0 = vcmask 1043456   ;;  %s3751_s14 = smov 127  }
  0x5a   : > { %366 = vmatprep.mubr.f32.mxu1 %v3750_v0  ;;  %295 = vmatprep.mubr.f32.mxu0 %v3750_v0  ;;  %v3948_v3 = vld [vmem:[%s3861_s4] sm:$0xff]  ;;  %v1169_v4 = vcombine.high %v3945_v2, %v3945_v2  ;;  %v3959_v6 = vld [vmem:[%s3861_s4 + $0x18] sm:$0xff]  ;;  %vm210_vm1 = vcmask 31744   ;;  %v3972_v8 = vcombine.high %v3942_v1, %v3942_v1  ;;  %v1160_v13 = vld [vmem:[%s3861_s4 + $0x28] sm:$0xf]  ;;  %s3752_s24 = smov 126  }
  0x5b   : > { %1180 = vrot.lane.b32.xlu1 %v3942_v1, %s3751_s14  ;;  %1176 = vrot.lane.b32.xlu0 %v3945_v2, %s3751_s14  ;;  %v1168_v5 = vcombine.high %v3948_v3, %v3948_v3  ;;  %v201_v7 = vld [vmem:[%s4277_s1] sm:$0xff]  ;;  %v3979_v9 = vcombine.high %v3959_v6, %v3959_v6  ;;  %v3329_v12 = vld [vmem:[%s4277_s1 + $0x18] sm:$0xff]  ;;  %vm1190_vm2 = vcmask 1039360   ;;  %vm2199_vm3 = vcmask 1031168   ;;  %s3434_s29 = sshll.u32 %s3731_s12, 3  ;;  %s3435_s21 = sshll.u32 %s3735_s13, 4 }
  0x5c   : > { %3320 = vmatprep.subr.msk.mxu1 %vm214_vm0, %v1169_v4  ;;  %v1159_v10 = vld [vmem:[%s3861_s4 + $0x20] sm:$0xff]  ;;  %v2169_v15 = vld [vmem:[%s3861_s4 + $0x28] sm:$0xf]  ;;  %v3381_v41 = vld [vmem:[%s4277_s1 + $0x38] sm:$0xff]  ;;  %s3202_s17 = sadd.s32 %s3435_s21, %s3434_s29  ;;  %s4298_s5 = sand.u32 1, %s3723_s10  }
  0x5d   : > { %3317 = vmatprep.subr.msk.mxu0 %vm214_vm0, %v1168_v5  ;;  %3321 = vmatpush1.msk.msra.mxu1 %vm214_vm0, %v3945_v2  ;;  %v1528_v11 = vcombine.high %v1159_v10, %v1159_v10  ;;  %v3342_v14 = vld [vmem:[%s4277_s1 + $0x30] sm:$0xff]  ;;  %v3355_v22 = vld [vmem:[%s4277_s1 + $0x8] sm:$0xff]  ;;  %v3368_v35 = vld [vmem:[%s4277_s1 + $0x20] sm:$0xff]  ;;  %s3436_s30 = sshll.u32 %s3202_s17, 7  ;;  %s3190_s28 = scalar_lea.sflag [#allocation6], %s4298_s5 }
  0x5e   : > { %3318 = vmatpush1.msk.msra.mxu0 %vm214_vm0, %v3948_v3  ;;  %3322 = vmatmul.mubr.msk.f32.vlgmr.msra.gmra.mrb[0].mxu1 %vm210_vm1, %v201_v7  ;;  %v3394_v51 = vld [vmem:[%s4277_s1 + $0x10] sm:$0xff]  ;;  %v3407_v59 = vld [vmem:[%s4277_s1 + $0x28] sm:$0xff]  ;;  %v3420_v62 = vld [vmem:[%s4277_s1 + $0x40] sm:$0xff]  ;;  %s4219_s3 = scalar_lea.hbm %s4278_s2, %s3436_s30  ;;  %p4299_p8 = scmp.ne.s32.totalorder %s4291_s22, 0 }
  0x5f   : > { %1178 = vrot.lane.b32.xlu1 %v1169_v4, %s3751_s14  ;;  %1172 = vrot.lane.b32.xlu0 %v3948_v3, %s3751_s14  ;;  %s3753_s4 = smov [#allocation5]  }
  0x60   : > { %3319 = vmatmul.mubr.msk.f32.vlgmr.msra.gmra.mrb[0].mxu0 %vm210_vm1, %v201_v7  ;;  %3326 = vmatprep.subr.msk.mxu1 %vm214_vm0, %v3979_v9  ;;  %s3655_s25 = sshll.u32 %s3753_s4, 4  ;;  %s3656_s25 = int_to_ptr.vmem [resolvable:$false] %s3655_s25 }
  0x61   : > { %3323 = vmatprep.subr.msk.mxu0 %vm214_vm0, %v3972_v8  ;;  %3327 = vmatpush1.msk.msra.mxu1 %vm214_vm0, %v3959_v6  ;;  %s3657_s26 = scalar_lea.vmem %s3656_s25, 2048 }
  0x62   : > { %508 = vmatprep.mubr.f32.mxu1 %v3750_v0  ;;  %3324 = vmatpush1.msk.msra.mxu0 %vm214_vm0, %v3942_v1 }
  0x63   : > { %1182 = vrot.lane.b32.xlu1 %v3972_v8, %s3751_s14  ;;  %1174 = vrot.lane.b32.xlu0 %v1168_v5, %s3751_s14 }
  0x64   : > { %437 = vmatprep.mubr.f32.mxu0 %v3750_v0  ;;  %3328 = vmatmul.mubr.msk.f32.vlgmr.msra.gmra.mrb[2].mxu1 %vm210_vm1, %v201_v7 }
  0x65   : > { %3325 = vmatmul.mubr.msk.f32.vlgmr.msra.gmra.mrb[2].mxu0 %vm210_vm1, %v201_v7  ;;  %3333 = vmatprep.subr.msk.mxu1 %vm214_vm0, %v3942_v1 }
  0x66   : > { %3330 = vmatprep.subr.msk.mxu0 %vm214_vm0, %v3945_v2  ;;  %3334 = vmatpush1.msk.msra.mxu1 %vm214_vm0, %v1169_v4 }
  0x67   : > { %1186 = vrot.lane.b32.xlu1 %v3979_v9, %s3751_s14  ;;  %1184 = vrot.lane.b32.xlu0 %v3959_v6, %s3751_s14 }
  0x68   : > { %666 = vmatprep.mubr.f32.mxu1 %v3750_v0  ;;  %3331 = vmatpush1.msk.msra.mxu0 %vm214_vm0, %v1168_v5 }
  0x69   : > { %595 = vmatprep.mubr.f32.mxu0 %v3750_v0  ;;  %3335 = vmatmul.mubr.msk.f32.vlgmr.msra.gmra.mrb[0].mxu1 %vm210_vm1, %v3329_v12 }
  0x6a   : > { %3332 = vmatmul.mubr.msk.f32.vlgmr.msra.gmra.mrb[0].mxu0 %vm210_vm1, %v3329_v12  ;;  %3339 = vmatprep.subr.msk.mxu1 %vm214_vm0, %v1159_v10 }
  0x6b   : > { %1529 = vrot.lane.b32.xlu1 %v1528_v11, %s3751_s14  ;;  %1188 = vrot.lane.b32.xlu0 %v1159_v10, %s3751_s14 }
  0x6c   : > { %3336 = vmatprep.subr.msk.mxu0 %vm214_vm0, %v3959_v6  ;;  %3340 = vmatpush1.msk.msra.mxu1 %vm214_vm0, %v3979_v9 }
  0x6d   : > { %808 = vmatprep.mubr.f32.mxu1 %v3750_v0  ;;  %3337 = vmatpush1.msk.msra.mxu0 %vm214_vm0, %v3972_v8 }
  0x6e   : > { %737 = vmatprep.mubr.f32.mxu0 %v3750_v0  ;;  %3341 = vmatmul.mubr.msk.f32.vlgmr.msra.gmra.mrb[2].mxu1 %vm210_vm1, %v3329_v12 }
  0x6f   : > { %2183 = vrot.lane.b32.xlu1 %v1168_v5, %s3752_s24  ;;  %1848 = vrot.lane.b32.xlu0 %v1160_v13, %s3751_s14 }
  0x70   : > { %3338 = vmatmul.mubr.msk.f32.vlgmr.msra.gmra.mrb[2].mxu0 %vm210_vm1, %v3329_v12  ;;  %3346 = vmatprep.subr.msk.mxu1 %vm214_vm0, %v3972_v8 }
  0x71   : > { %3343 = vmatprep.subr.msk.mxu0 %vm214_vm0, %v1169_v4  ;;  %3347 = vmatpush1.msk.msra.mxu1 %vm214_vm0, %v3942_v1 }
  0x72   : > { %982 = vmatprep.mubr.f32.mxu1 %v3750_v0  ;;  %3344 = vmatpush1.msk.msra.mxu0 %vm214_vm0, %v3945_v2 }
  0x73   : > { %2187 = vrot.lane.b32.xlu1 %v1169_v4, %s3752_s24  ;;  %2185 = vrot.lane.b32.xlu0 %v3945_v2, %s3752_s24 }
  0x74   : > { %911 = vmatprep.mubr.f32.mxu0 %v3750_v0  ;;  %3348 = vmatmul.mubr.msk.f32.vlgmr.msra.gmra.mrb[0].mxu1 %vm210_vm1, %v3342_v14 }
  0x75   : > { %3345 = vmatmul.mubr.msk.f32.vlgmr.msra.gmra.mrb[0].mxu0 %vm210_vm1, %v3342_v14  ;;  %3352 = vmatprep.subr.msk.mxu1 %vm214_vm0, %v1528_v11 }
  0x76   : > { %3349 = vmatprep.subr.msk.mxu0 %vm214_vm0, %v3979_v9  ;;  %3353 = vmatpush1.msk.msra.mxu1 %vm214_vm0, %v1159_v10 }
  0x77   : > { %2181 = vrot.lane.b32.xlu1 %v3948_v3, %s3752_s24  ;;  %2189 = vrot.lane.b32.xlu0 %v3942_v1, %s3752_s24 }
  0x78   : > { %1124 = vmatprep.mubr.f32.mxu1 %v3750_v0  ;;  %3350 = vmatpush1.msk.msra.mxu0 %vm214_vm0, %v3959_v6 }
  0x79   : > { %1053 = vmatprep.mubr.f32.mxu0 %v3750_v0  ;;  %3354 = vmatmul.mubr.msk.f32.vlgmr.msra.gmra.mrb[2].mxu1 %vm210_vm1, %v3342_v14 }
  0x7a   : > { %3351 = vmatmul.mubr.msk.f32.vlgmr.msra.gmra.mrb[2].mxu0 %vm210_vm1, %v3342_v14  ;;  %1353 = vmatprep.mubr.f32.mxu1 %v3750_v0 }
  0x7b   : > { %2191 = vrot.lane.b32.xlu0 %v3972_v8, %s3752_s24  ;;  %2193 = vrot.lane.b32.xlu1 %v3959_v6, %s3752_s24 }
  0x7c   : > { %1282 = vmatprep.mubr.f32.mxu0 %v3750_v0 }
  0x7f   : > { %2195 = vrot.lane.b32.xlu0 %v3979_v9, %s3752_s24  ;;  %2197 = vrot.lane.b32.xlu1 %v1159_v10, %s3752_s24 }
  0x83   : > { %2538 = vrot.lane.b32.xlu0 %v1528_v11, %s3752_s24  ;;  %2857 = vrot.lane.b32.xlu1 %v2169_v15, %s3752_s24  ;;  %s3206_s24 = sshll.u32 %s3935_s27, 4  ;;  %s4221_s24 = int_to_ptr.vmem [resolvable:$true] %s3206_s24 }
  0x84   : > { %s3651_s18 = scalar_lea.vmem %s4221_s24, 1024  ;;  %p3658_p13 = scmp.lt.s32.totalorder %s4221_s24, %s3656_s25 }
  0x85   : > { %p3652_p3 = scmp.ne.s32.totalorder %s4221_s24, %s3651_s18  ;;  %p3659_p4 = scmp.lt.s32.totalorder %s3657_s26, %s3651_s18 }
  0x87   : > { %p3653_p11 = pnand %p3652_p3, %p4299_p8  ;;  %p3660_p6 = por %p3659_p4, %p3658_p13 }
  0x89   : > { %p3654_p12 = pneg %p3653_p11 }
  0x8b   : > { %p3661_p5 = pnand %p3660_p6, %p3654_p12 }
  0xcd   : > { %v1181_v16 = vpop.permute.xlu1 %1180  ;;  %v1177_v17 = vpop.permute.xlu0 %1176 }
  0xd1   : > { %v1179_v18 = vpop.permute.xlu1 %1178  ;;  %v1173_v19 = vpop.permute.xlu0 %1172 }
  0xd2   : > { %v1193_v20 = vsel %vm1190_vm2, %v1177_v17, %v1179_v18  ;;  %v1194_v21 = vsel %vm1190_vm2, %v1179_v18, %v1181_v16 }
  0xd3   : > { %3359 = vmatprep.subr.msk.mxu1 %vm214_vm0, %v1194_v21 }
  0xd4   : > { %3360 = vmatpush1.msk.msra.mxu1 %vm214_vm0, %v1193_v20 }
  0xd5   : > { %v1183_v23 = vpop.permute.xlu1 %1182  ;;  %v1175_v24 = vpop.permute.xlu0 %1174  ;;  %3361 = vmatmul.mubr.msk.f32.vlgmr.msra.gmra.mrb[0].mxu1 %vm210_vm1, %v3355_v22 }
  0xd6   : > { %v1191_v25 = vsel %vm1190_vm2, %v1173_v19, %v1175_v24  ;;  %v1192_v26 = vsel %vm1190_vm2, %v1175_v24, %v1177_v17  ;;  %1495 = vmatprep.mubr.f32.mxu1 %v3750_v0  ;;  %v1195_v30 = vsel %vm1190_vm2, %v1181_v16, %v1183_v23 }
  0xd7   : > { %3356 = vmatprep.subr.msk.mxu0 %vm214_vm0, %v1192_v26 }
  0xd8   : > { %3357 = vmatpush1.msk.msra.mxu0 %vm214_vm0, %v1191_v25 }
  0xd9   : > { %v1187_v27 = vpop.permute.xlu1 %1186  ;;  %v1185_v28 = vpop.permute.xlu0 %1184  ;;  %3358 = vmatmul.mubr.msk.f32.vlgmr.msra.gmra.mrb[0].mxu0 %vm210_vm1, %v3355_v22 }
  0xda   : > { %v1196_v29 = vsel %vm1190_vm2, %v1183_v23, %v1185_v28  ;;  %1424 = vmatprep.mubr.f32.mxu0 %v3750_v0  ;;  %v1197_v33 = vsel %vm1190_vm2, %v1185_v28, %v1187_v27 }
  0xdb   : > { %3362 = vmatprep.subr.msk.mxu0 %vm214_vm0, %v1196_v29 }
  0xdc   : > { %3363 = vmatpush1.msk.msra.mxu0 %vm214_vm0, %v1195_v30 }
  0xdd   : > { %v1530_v31 = vpop.permute.xlu1 %1529  ;;  %v1189_v32 = vpop.permute.xlu0 %1188  ;;  %3364 = vmatmul.mubr.msk.f32.vlgmr.msra.gmra.mrb[2].mxu0 %vm210_vm1, %v3355_v22  ;;  %3369 = vmatprep.subr.msk.mxu0 %vm214_vm0, %v1193_v20 }
  0xde   : > { %v1198_v34 = vsel %vm1190_vm2, %v1187_v27, %v1189_v32  ;;  %3370 = vmatpush1.msk.msra.mxu0 %vm214_vm0, %v1192_v26  ;;  %1601 = vmatprep.mubr.f32.mxu0 %v3750_v0  ;;  %v1531_v38 = vsel %vm1190_vm2, %v1189_v32, %v1530_v31 }
  0xdf   : > { %3365 = vmatprep.subr.msk.mxu1 %vm214_vm0, %v1198_v34  ;;  %3375 = vmatprep.subr.msk.mxu0 %vm214_vm0, %v1197_v33 }
  0xe0   : > { %3366 = vmatpush1.msk.msra.mxu1 %vm214_vm0, %v1197_v33 }
  0xe1   : > { %v2184_v36 = vpop.permute.xlu1 %2183  ;;  %v1849_v37 = vpop.permute.xlu0 %1848  ;;  %3367 = vmatmul.mubr.msk.f32.vlgmr.msra.gmra.mrb[2].mxu1 %vm210_vm1, %v3355_v22  ;;  %3371 = vmatmul.mubr.msk.f32.vlgmr.msra.gmra.mrb[0].mxu0 %vm210_vm1, %v3368_v35 }
  0xe2   : > { %3372 = vmatprep.subr.msk.mxu1 %vm214_vm0, %v1195_v30  ;;  %3376 = vmatpush1.msk.msra.mxu0 %vm214_vm0, %v1196_v29  ;;  %v1850_v44 = vsel %vm1190_vm2, %v1530_v31, %v1849_v37 }
  0xe3   : > { %3373 = vmatpush1.msk.msra.mxu1 %vm214_vm0, %v1194_v21  ;;  %3382 = vmatprep.subr.msk.mxu0 %vm214_vm0, %v1194_v21 }
  0xe4   : > { %3378 = vmatprep.subr.msk.mxu1 %vm214_vm0, %v1531_v38  ;;  %1672 = vmatprep.mubr.f32.mxu1 %v3750_v0 }
  0xe5   : > { %1743 = vmatprep.mubr.f32.mxu0 %v3750_v0  ;;  %v2188_v39 = vpop.permute.xlu1 %2187  ;;  %v2186_v40 = vpop.permute.xlu0 %2185  ;;  %3374 = vmatmul.mubr.msk.f32.vlgmr.msra.gmra.mrb[0].mxu1 %vm210_vm1, %v3368_v35 }
  0xe6   : > { %3377 = vmatmul.mubr.msk.f32.vlgmr.msra.gmra.mrb[2].mxu0 %vm210_vm1, %v3368_v35  ;;  %3379 = vmatpush1.msk.msra.mxu1 %vm214_vm0, %v1198_v34  ;;  %v2201_v45 = vsel %vm2199_vm3, %v2184_v36, %v2186_v40  ;;  %v2202_v52 = vsel %vm2199_vm3, %v2186_v40, %v2188_v39 }
  0xe7   : > { %3383 = vmatpush1.msk.msra.mxu0 %vm214_vm0, %v1193_v20  ;;  %3385 = vmatprep.subr.msk.mxu1 %vm214_vm0, %v1196_v29 }
  0xe8   : > { %3388 = vmatprep.subr.msk.mxu0 %vm214_vm0, %v1198_v34  ;;  %1814 = vmatprep.mubr.f32.mxu1 %v3750_v0 }
  0xe9   : > { %1920 = vmatprep.mubr.f32.mxu0 %v3750_v0  ;;  %v2182_v42 = vpop.permute.xlu1 %2181  ;;  %v2190_v43 = vpop.permute.xlu0 %2189  ;;  %3380 = vmatmul.mubr.msk.f32.vlgmr.msra.gmra.mrb[2].mxu1 %vm210_vm1, %v3368_v35 }
  0xea   : > { %3384 = vmatmul.mubr.msk.f32.vlgmr.msra.gmra.mrb[0].mxu0 %vm210_vm1, %v3381_v41  ;;  %3386 = vmatpush1.msk.msra.mxu1 %vm214_vm0, %v1195_v30  ;;  %v2200_v48 = vsel %vm2199_vm3, %v2182_v42, %v2184_v36  ;;  %v2203_v49 = vsel %vm2199_vm3, %v2188_v39, %v2190_v43 }
  0xeb   : > { %3389 = vmatpush1.msk.msra.mxu0 %vm214_vm0, %v1197_v33  ;;  %3391 = vmatprep.subr.msk.mxu1 %vm214_vm0, %v1850_v44 }
  0xec   : > { %3395 = vmatprep.subr.msk.mxu0 %vm214_vm0, %v2201_v45  ;;  %1991 = vmatprep.mubr.f32.mxu1 %v3750_v0 }
  0xed   : > { %2062 = vmatprep.mubr.f32.mxu0 %v3750_v0  ;;  %v2192_v46 = vpop.permute.xlu0 %2191  ;;  %3387 = vmatmul.mubr.msk.f32.vlgmr.msra.gmra.mrb[0].mxu1 %vm210_vm1, %v3381_v41  ;;  %v2194_v47 = vpop.permute.xlu1 %2193 }
  0xee   : > { %3390 = vmatmul.mubr.msk.f32.vlgmr.msra.gmra.mrb[2].mxu0 %vm210_vm1, %v3381_v41  ;;  %3392 = vmatpush1.msk.msra.mxu1 %vm214_vm0, %v1531_v38  ;;  %v2205_v50 = vsel %vm2199_vm3, %v2192_v46, %v2194_v47  ;;  %v2204_v55 = vsel %vm2199_vm3, %v2190_v43, %v2192_v46 }
  0xef   : > { %3396 = vmatpush1.msk.msra.mxu0 %vm214_vm0, %v2200_v48  ;;  %3398 = vmatprep.subr.msk.mxu1 %vm214_vm0, %v2203_v49 }
  0xf0   : > { %2133 = vmatprep.mubr.f32.mxu1 %v3750_v0  ;;  %2291 = vmatprep.mubr.f32.mxu0 %v3750_v0 }
  0xf1   : > { %3401 = vmatprep.subr.msk.mxu0 %vm214_vm0, %v2205_v50  ;;  %v2196_v53 = vpop.permute.xlu0 %2195  ;;  %3393 = vmatmul.mubr.msk.f32.vlgmr.msra.gmra.mrb[2].mxu1 %vm210_vm1, %v3381_v41  ;;  %v2198_v54 = vpop.permute.xlu1 %2197 }
  0xf2   : > { %3397 = vmatmul.mubr.msk.f32.vlgmr.msra.gmra.mrb[0].mxu0 %vm210_vm1, %v3394_v51  ;;  %3399 = vmatpush1.msk.msra.mxu1 %vm214_vm0, %v2202_v52  ;;  %v2207_v56 = vsel %vm2199_vm3, %v2196_v53, %v2198_v54  ;;  %v2206_v57 = vsel %vm2199_vm3, %v2194_v47, %v2196_v53 }
  0xf3   : > { %3402 = vmatpush1.msk.msra.mxu0 %vm214_vm0, %v2204_v55  ;;  %2362 = vmatprep.mubr.f32.mxu1 %v3750_v0 }
  0xf4   : > { %3408 = vmatprep.subr.msk.mxu0 %vm214_vm0, %v2202_v52  ;;  %2433 = vmatprep.mubr.f32.mxu0 %v3750_v0 }
  0xf5   : > { %3404 = vmatprep.subr.msk.mxu1 %vm214_vm0, %v2207_v56  ;;  %3400 = vmatmul.mubr.msk.f32.vlgmr.msra.gmra.mrb[0].mxu1 %vm210_vm1, %v3394_v51  ;;  %v2539_v58 = vpop.permute.xlu0 %2538  ;;  %v2858_v61 = vpop.permute.xlu1 %2857 }
  0xf6   : > { %3403 = vmatmul.mubr.msk.f32.vlgmr.msra.gmra.mrb[2].mxu0 %vm210_vm1, %v3394_v51  ;;  %3405 = vmatpush1.msk.msra.mxu1 %vm214_vm0, %v2206_v57  ;;  %v2540_v60 = vsel %vm2199_vm3, %v2198_v54, %v2539_v58  ;;  %v2859_v63 = vsel %vm2199_vm3, %v2539_v58, %v2858_v61 }
  0xf7   : > { %3409 = vmatpush1.msk.msra.mxu0 %vm214_vm0, %v2201_v45  ;;  %3411 = vmatprep.subr.msk.mxu1 %vm214_vm0, %v2204_v55 }
  0xf8   : > { %3414 = vmatprep.subr.msk.mxu0 %vm214_vm0, %v2206_v57  ;;  %2504 = vmatprep.mubr.f32.mxu1 %v3750_v0 }
  0xf9   : > { %2610 = vmatprep.mubr.f32.mxu0 %v3750_v0  ;;  %3406 = vmatmul.mubr.msk.f32.vlgmr.msra.gmra.mrb[2].mxu1 %vm210_vm1, %v3394_v51 }
  0xfa   : > { %3410 = vmatmul.mubr.msk.f32.vlgmr.msra.gmra.mrb[0].mxu0 %vm210_vm1, %v3407_v59  ;;  %3412 = vmatpush1.msk.msra.mxu1 %vm214_vm0, %v2203_v49 }
  0xfb   : > { %3415 = vmatpush1.msk.msra.mxu0 %vm214_vm0, %v2205_v50  ;;  %3417 = vmatprep.subr.msk.mxu1 %vm214_vm0, %v2540_v60 }
  0xfc   : > { %3421 = vmatprep.subr.msk.mxu0 %vm214_vm0, %v2203_v49  ;;  %2681 = vmatprep.mubr.f32.mxu1 %v3750_v0 }
  0xfd   : > { %2752 = vmatprep.mubr.f32.mxu0 %v3750_v0  ;;  %3413 = vmatmul.mubr.msk.f32.vlgmr.msra.gmra.mrb[0].mxu1 %vm210_vm1, %v3407_v59 }
  0xfe   : > { %3416 = vmatmul.mubr.msk.f32.vlgmr.msra.gmra.mrb[2].mxu0 %vm210_vm1, %v3407_v59  ;;  %3418 = vmatpush1.msk.msra.mxu1 %vm214_vm0, %v2207_v56 }
  0xff   : > { %3422 = vmatpush1.msk.msra.mxu0 %vm214_vm0, %v2202_v52  ;;  %3424 = vmatprep.subr.msk.mxu1 %vm214_vm0, %v2205_v50 }
 0x100   : > { %3427 = vmatprep.subr.msk.mxu0 %vm214_vm0, %v2207_v56  ;;  %2823 = vmatprep.mubr.f32.mxu1 %v3750_v0 }
 0x101   : > { %2929 = vmatprep.mubr.f32.mxu0 %v3750_v0  ;;  %3419 = vmatmul.mubr.msk.f32.vlgmr.msra.gmra.mrb[2].mxu1 %vm210_vm1, %v3407_v59 }
 0x102   : > { %3423 = vmatmul.mubr.msk.f32.vlgmr.msra.gmra.mrb[0].mxu0 %vm210_vm1, %v3420_v62  ;;  %3425 = vmatpush1.msk.msra.mxu1 %vm214_vm0, %v2204_v55 }
 0x103   : > { %3428 = vmatpush1.msk.msra.mxu0 %vm214_vm0, %v2206_v57  ;;  %3430 = vmatprep.subr.msk.mxu1 %vm214_vm0, %v2859_v63 }
 0x104   : > { %3000 = vmatprep.mubr.f32.mxu1 %v3750_v0  ;;  %3071 = vmatprep.mubr.f32.mxu0 %v3750_v0 }
 0x105   : > { %3426 = vmatmul.mubr.msk.f32.vlgmr.msra.gmra.mrb[0].mxu1 %vm210_vm1, %v3420_v62 }
 0x106   : > { %3429 = vmatmul.mubr.msk.f32.vlgmr.msra.gmra.mrb[2].mxu0 %vm210_vm1, %v3420_v62  ;;  %3431 = vmatpush1.msk.msra.mxu1 %vm214_vm0, %v2540_v60 }
 0x107   : > { %3142 = vmatprep.mubr.f32.mxu1 %v3750_v0 }
 0x109   : > { %3432 = vmatmul.mubr.msk.f32.vlgmr.msra.gmra.mrb[2].mxu1 %vm210_vm1, %v3420_v62 }
 0x1d5   : > { %v2931_v1 = vpop.f32.mrb[0].mxu0 }
 0x1d6   : > { %3181 = vst [vmem:[%s3935_s27] sm:$0xff] %v2931_v1  ;;  %v2933_v2 = vpop.f32.mrb[1].mxu0 }
 0x1d7   : > { %3182 = vst [vmem:[%s3935_s27 + $0x8] sm:$0xff] %v2933_v2 }
 0x1d8   : > { %v3002_v3 = vpop.f32.mrb[0].mxu1 }
 0x1d9   : > { %3183 = vst [vmem:[%s3935_s27 + $0x10] sm:$0xff] %v3002_v3  ;;  %v3073_v4 = vpop.f32.mrb[2].mxu0  ;;  %v3004_v5 = vpop.f32.mrb[1].mxu1 }
 0x1da   : > { %3185 = vst [vmem:[%s3935_s27 + $0x20] sm:$0xff] %v3073_v4  ;;  %3184 = vst [vmem:[%s3935_s27 + $0x18] sm:$0xff] %v3004_v5  ;;  %v3075_v0 = vpop.f32.mrb[3].mxu0 }
 0x1db   : > { %3186 = vst [vmem:[%s3935_s27 + $0x28] sm:$0xff] %v3075_v0 }
 0x1dc   : > { %v3144_v6 = vpop.f32.mrb[2].mxu1 }
 0x1dd   : > { %3187 = vst [vmem:[%s3935_s27 + $0x30] sm:$0xff] %v3144_v6  ;;  %v3146_v7 = vpop.f32.mrb[3].mxu1 }
 0x1de   : > { %3188 = vst [vmem:[%s3935_s27 + $0x38] sm:$0xff] %v3146_v7 }
 0x1df   : > { %3664 = shalt.err (!%p3661_p5)
}
 0x1e0   : > { %s3665_s27 = scalar_lea.hbm %s4219_s3, 1024  ;;  %s3669_s8 = scalar_lea.hbm %s4278_s2, 4096 }
 0x1e1   : > { %p3666_p7 = scmp.ne.s32.totalorder %s4219_s3, %s3665_s27  ;;  %p3670_p0 = scmp.lt.u32.totalorder %s4219_s3, %s4278_s2 }
 0x1e2   : > { %p3671_p1 = scmp.lt.u32.totalorder %s3669_s8, %s3665_s27  ;;  %p3673_p3 = scmp.lt.u32.totalorder %s3665_s27, %s4219_s3 }
 0x1e3   : > { %p3667_p9 = pnand %p3666_p7, %p4299_p8 }
 0x1e4   : > { %p3672_p2 = por %p3671_p1, %p3670_p0 }
 0x1e5   : > { %p3668_p10 = pneg %p3667_p9 }
 0x1e6   : > { %p3674_p11 = por %p3673_p3, %p3672_p2 }
 0x1e8   : > { %p3675_p12 = pnand %p3674_p11, %p3668_p10 }
 0x1ea   : > { %3678 = shalt.err (!%p3675_p12)
}
 0x1eb   : > { %3514 = dma.vmem_to_hbm [thread:$0]  (%p4299_p8), %s4221_s24, 1024, %s4219_s3, %s3190_s28  }
 0x1ec PF: > { %p3522_p13 = scmp.ge.s32.totalorder %s3747_s16, 2  ;;  %s3218_s19 = sand.u32 1, %s3719_s9  }
 0x1ed   : > { %p4300_p4 = scmp.ne.s32.totalorder %s4293_s23, 0  ;;  %s3219_s14 = scalar_lea.sflag [#allocation6], %s3218_s19 }
 0x1ef   : > { %p3517_p6 = pnand %p3522_p13, %p4300_p4 }
 0x1f1   : > { %3714 = dma.done.wait (!%p3517_p6), %s3219_s14, 1024  }
 0x1f2   : > { %3716 = vsyncadd (!%p3517_p6), %s3219_s14, 4294966272  ;;  %s15_s16 = sadd.s32 1, %s3747_s16   ;;  %s4301_s22 = sld [smem:[#allocation19_spill]] }
 0x1f3   : > { %p12_p5 = scmp.ge.s32.totalorder %s15_s16, 6   ;;  %s4302_s12 = sld [smem:[#allocation15_spill]] }
 0x1f4   : > { %s4303_s13 = sld [smem:[#allocation16_spill]]  ;;  %s4304_s14 = sld [smem:[#allocation17_spill]] }
 0x1f5   : > { %s4305_s15 = sld [smem:[#allocation18_spill]]  ;;  %s4306_s9 = smov %s3723_s10 }
 0x1f6   : > { %s4307_s10 = smov %s3727_s11  ;;  %14 = sbr.rel (!%p12_p5) target bundleno = 5 (0x5), region = 89 }
 0x1f8   : > { %s4308_s11 = smov %s4301_s22 }
 0x1fd   :  { %3224 = vsyncpa [#allocation6], 1 }
 0x1fe   :  { %3226 = vsyncpa [#allocation6 + $0x1], 1 }
 0x1ff   :  { %3227 = vsyncmov [#allocation3] }
 0x202   :  { %s3228_s23 = vpop.sfrf %3227 }
 0x203   :  { %p3439_p8 = scmp.ne.s32.totalorder %s3228_s23, 0 }
 0x205   :  { %3232 = shalt.err (%p3439_p8)  }
 0x206   :  { %3234 = vsyncmov [#allocation3 + $0x1] }
 0x209   :  { %s3235_s29 = vpop.sfrf %3234 }
 0x20a   :  { %p3440_p7 = scmp.ne.s32.totalorder %s3235_s29, 0 }
 0x20c   :  { %3239 = shalt.err (%p3440_p7)  }

</bundles_post_ra>
